<compile_context>
chip_gen: v7x
topology: tpu7x:2x2x1
jax: 0.10.0
libtpu: 0.0.40
codegen_flags: <defaults>
</compile_context>

<pallas_src>
import jax
import jax.numpy as jnp
from jax.experimental import pallas as pl
from jax.experimental.pallas import tpu as pltpu

_LANE = 128
_MAX_ROW_TILE = 1024          # >=512-row tiles reach ~85% of HBM roofline (v6e data)
_MIN_PARALLEL_ROWS = 512      # at/above this, force >= 2 row tiles (v7x megacore)


def _round_up(n, m):
    return ((n + m - 1) // m) * m


def _const_spec(shape):
    """Whole-array, grid-invariant block; single-buffered when supported."""
    index_map = lambda i: (0, 0)
    try:
        return pl.BlockSpec(shape, index_map, pipeline_mode=pl.Buffered(1))
    except TypeError:  # older jax without pipeline_mode on BlockSpec
        return pl.BlockSpec(shape, index_map)


def _make_kernel(o, kp):
    def kernel(x_ref, w12_ref, w2t_ref, bz_ref, b2_ref, o_ref):
        # x_ref  : [rt, CWp]     rows=(b,h), cols=(c,w) flattened + lane-padded
        # w12_ref: [CWp, O*Kp]   conv1x1 (x) linear1, Kronecker-folded, per-o K-padded
        # w2t_ref: [Kp, Jp]      linear2 weight, transposed + zero-padded
        # bz_ref : [1, O*Kp]     conv+linear1 bias (exact affine fold)
        # b2_ref : [1, Jp]       linear2 bias (zero-padded)
        # o_ref  : [rt*O, Jp]
        rt = x_ref.shape[0]
        z = jnp.dot(x_ref[...], w12_ref[...], preferred_element_type=jnp.float32)
        z = z + bz_ref[...]
        z2 = z.reshape(rt * o, kp)      # move `o` into the row dim (no-op for O=1)
        out = jnp.dot(z2.astype(w2t_ref.dtype), w2t_ref[...],
                      preferred_element_type=jnp.float32)
        out = out + b2_ref[...]
        o_ref[...] = out.astype(o_ref.dtype)
    return kernel


def _choose_row_tile(R, per_row_bytes, weight_bytes, vmem_budget):
    avail = max(vmem_budget - weight_bytes, 8 * per_row_bytes)
    cap = int(avail // max(per_row_bytes, 1))
    cap = max(8, min(cap, _MAX_ROW_TILE))
    cap = (cap // 8) * 8
    if R <= cap and R < _MIN_PARALLEL_ROWS:
        return R, R                                  # one grid step covers all rows
    # multi-tile: at least 2 tiles so both v7x TensorCores have work
    half = _round_up(-(-R // 2), 8)
    row_tile = max(8, min(cap, half))
    row_tile = (row_tile // 8) * 8
    return row_tile, _round_up(R, row_tile)


def classification_forward(x, params, *, use_bf16=False):
    """x: [B, Cin, Hs, Ws] float32 (NCHW); Ws must equal linear1 in_features."""
    wc, bc, w1, b1, w2, b2 = params
    B, Cin, Hs, Ws = x.shape
    O = wc.shape[0]          # conv output channels (output_dim)
    K = w1.shape[0]          # hidden_channel
    J = w2.shape[0]          # output_channel
    assert w1.shape[1] == Ws, "last input dim must equal height*width"

    R = B * Hs
    CW = Cin * Ws
    CWp = _round_up(CW, _LANE)
    Kp = _round_up(K, _LANE)              # lane-dense intermediate (per o)
    Jp = _round_up(J, _LANE)              # lane-dense output

    compute_dt = jnp.bfloat16 if use_bf16 else x.dtype

    # ---- host-side (XLA, once, outside the hot kernel) parameter folding ----
    # conv1x1 folded into linear1: W12[(c,w),(o,k)] = wc[o,c] * w1[k,w]
    w1p = jnp.pad(w1, ((0, Kp - K), (0, 0)))
    w12 = jnp.einsum("oc,kw->cwok", wc, w1p).reshape(CW, O * Kp)
    w12p = jnp.pad(w12, ((0, CWp - CW), (0, 0))).astype(compute_dt)
    # z-level bias (exact -- the conv+linear1 composite is affine):
    #   bz[(o,k)] = bc[o] * sum_w w1[k,w] + b1[k]
    b1p = jnp.pad(b1, (0, Kp - K))
    w1rs = jnp.pad(jnp.sum(w1, axis=1), (0, Kp - K))
    bz = (bc[:, None] * w1rs[None, :] + b1p[None, :]).reshape(1, O * Kp)
    bz = bz.astype(jnp.float32)
    # linear2 weight transposed + padded (padded K rows are zero -> exact)
    w2t = jnp.pad(w2.T, ((0, Kp - K), (0, Jp - J))).astype(compute_dt)
    b2p = jnp.pad(b2, (0, Jp - J)).reshape(1, Jp).astype(jnp.float32)

    # ---- activation slab: rows = (b, h), cols = (c, w), lane-padded ----
    # TODO(synk): for large activations (Ws >= ~128) fold this transpose/pad into
    # the kernel via a Cin grid axis + VMEM accumulator to avoid an extra HBM pass.
    xflat = jnp.transpose(x, (0, 2, 1, 3)).reshape(R, CW)
    if CWp != CW:
        xflat = jnp.pad(xflat, ((0, 0), (0, CWp - CW)))
    xflat = xflat.astype(compute_dt)

    # ---- VMEM-budget-derived row tiling ----
    isz_in = jnp.dtype(compute_dt).itemsize
    isz_out = jnp.dtype(x.dtype).itemsize
    weight_bytes = (CWp * O * Kp + Kp * Jp) * isz_in + (O * Kp + Jp) * 4
    per_row_bytes = (2 * CWp * isz_in             # double-buffered x tile
                     + 2 * O * Jp * isz_out       # double-buffered out tile
                     + O * Kp * 4 + O * Jp * 4)   # in-kernel f32 intermediates
    try:
        vmem_cap = int(getattr(pltpu.get_tpu_info(), "vmem_capacity_bytes",
                               64 * 1024 * 1024))
    except Exception:  # hardware query unavailable -> conservative (v7x per-TC)
        vmem_cap = 64 * 1024 * 1024
    row_tile, Rp = _choose_row_tile(R, per_row_bytes, weight_bytes, vmem_cap // 2)
    if Rp != R:
        xflat = jnp.pad(xflat, ((0, Rp - R), (0, 0)))

    est_bytes = weight_bytes + row_tile * per_row_bytes
    vmem_limit = int(min(vmem_cap * 0.9,
                         max(2 * est_bytes + (16 << 20), 64 << 20)))

    grid = (Rp // row_tile,)
    kernel = _make_kernel(O, Kp)

    out = pl.pallas_call(
        kernel,
        out_shape=jax.ShapeDtypeStruct((Rp * O, Jp), x.dtype),
        grid_spec=pltpu.PrefetchScalarGridSpec(
            num_scalar_prefetch=0,
            grid=grid,
            in_specs=[
                pl.BlockSpec((row_tile, CWp), lambda i: (i, 0)),
                _const_spec((CWp, O * Kp)),
                _const_spec((Kp, Jp)),
                _const_spec((1, O * Kp)),
                _const_spec((1, Jp)),
            ],
            out_specs=pl.BlockSpec((row_tile * O, Jp), lambda i: (i, 0)),
        ),
        compiler_params=pltpu.CompilerParams(
            dimension_semantics=("parallel",),
            vmem_limit_bytes=vmem_limit,
        ),
    )(xflat, w12p, w2t, bz, b2p)

    # TODO(synk): for very large R the Jp-vs-J writeback padding dominates HBM
    # store traffic; an in-kernel sublane->lane repack (idle XLU) would trim it.
    out = out[: R * O, :J].reshape(B, Hs, O, J)
    return jnp.transpose(out, (0, 2, 1, 3))


def reference_forward(x, params):
    """Pure-JAX mirror of the PyTorch forward, for validation."""
    wc, bc, w1, b1, w2, b2 = params
    y = jnp.einsum("bchw,oc->bohw", x, wc) + bc[None, :, None, None]
    z = jnp.einsum("bohw,kw->bohk", y, w1) + b1
    o = jnp.einsum("bohk,jk->bohj", z, w2) + b2
    return o


def init_params(key, hidden_2dim, height, width, output_dim, hidden_channel, output_channel):
    ks = jax.random.split(key, 6)
    in1 = height * width
    wc = jax.random.normal(ks[0], (output_dim, hidden_2dim), jnp.float32) * 0.1
    bc = jax.random.normal(ks[1], (output_dim,), jnp.float32) * 0.1
    w1 = jax.random.normal(ks[2], (hidden_channel, in1), jnp.float32) * 0.1
    b1 = jax.random.normal(ks[3], (hidden_channel,), jnp.float32) * 0.1
    w2 = jax.random.normal(ks[4], (output_channel, hidden_channel), jnp.float32) * 0.1
    b2 = jax.random.normal(ks[5], (output_channel,), jnp.float32) * 0.1
    return (wc, bc, w1, b1, w2, b2)


if __name__ == "__main__":
    # Module hyper-params (small): hidden_2dim=4, height=4, width=4 -> H*W=16,
    # output_dim=1, hidden_channel=32, output_channel=8.
    hidden_2dim, height, width = 4, 4, 4
    output_dim, hidden_channel, output_channel = 1, 32, 8

    B, Hs = 2, 16
    Ws = height * width  # last dim must equal height*width for the Linear layers

    key = jax.random.PRNGKey(0)
    kx, kp = jax.random.split(key)
    x = jax.random.normal(kx, (B, hidden_2dim, Hs, Ws), jnp.float32)
    params = init_params(kp, hidden_2dim, height, width,
                         output_dim, hidden_channel, output_channel)

    out = classification_forward(x, params)
    out = jax.block_until_ready(out)

    ref = reference_forward(x, params)
    assert out.shape == (B, output_dim, Hs, output_channel), out.shape
    assert jnp.allclose(out, ref, atol=1e-4, rtol=1e-4), "mismatch vs reference"

    print("KERNEL_OK")
</pallas_src>

<mosaic_0001>
module attributes {stable_mosaic.version = 11 : i64} {
  func.func @kernel(%arg0: i32, %arg1: memref<32x128xf32, #tpu.memory_space<vmem>>, %arg2: memref<128x128xf32, #tpu.memory_space<vmem>>, %arg3: memref<128x128xf32, #tpu.memory_space<vmem>>, %arg4: memref<1x128xf32, #tpu.memory_space<vmem>>, %arg5: memref<1x128xf32, #tpu.memory_space<vmem>>, %arg6: memref<32x128xf32, #tpu.memory_space<vmem>>) attributes {dimension_semantics = [#tpu.dimension_semantics<parallel>], iteration_bounds = array<i64: 1>, scalar_prefetch = 0 : i64, scratch_operands = 0 : i64, tpu.core_type = #tpu.core_type<tc>, window_params = [{transform_indices = @transform_0, window_bounds = array<i64: 32, 128>}, {pipeline_mode = #tpu.pipeline_mode<synchronous>, transform_indices = @transform_1, window_bounds = array<i64: 128, 128>}, {pipeline_mode = #tpu.pipeline_mode<synchronous>, transform_indices = @transform_2, window_bounds = array<i64: 128, 128>}, {pipeline_mode = #tpu.pipeline_mode<synchronous>, transform_indices = @transform_3, window_bounds = array<i64: 1, 128>}, {pipeline_mode = #tpu.pipeline_mode<synchronous>, transform_indices = @transform_4, window_bounds = array<i64: 1, 128>}, {transform_indices = @transform_5, window_bounds = array<i64: 32, 128>}]} {
    %c0 = arith.constant 0 : index
    %c0_0 = arith.constant 0 : index
    %0 = vector.load %arg1[%c0, %c0_0] : memref<32x128xf32, #tpu.memory_space<vmem>>, vector<32x128xf32>
    %c0_1 = arith.constant 0 : index
    %c0_2 = arith.constant 0 : index
    %1 = vector.load %arg2[%c0_1, %c0_2] : memref<128x128xf32, #tpu.memory_space<vmem>>, vector<128x128xf32>
    %cst = arith.constant dense<0.000000e+00> : vector<32x128xf32>
    %2 = tpu.matmul %0, %1, %cst {dimension_numbers = #tpu.dot_dimension_numbers<[1], [0], [0], [1], [0, 0, 1, 1], [], []>} : vector<32x128xf32>, vector<128x128xf32>, vector<32x128xf32> -> vector<32x128xf32>
    %c0_3 = arith.constant 0 : index
    %c0_4 = arith.constant 0 : index
    %3 = vector.load %arg4[%c0_3, %c0_4] : memref<1x128xf32, #tpu.memory_space<vmem>>, vector<1x128xf32>
    %4 = vector.broadcast %3 : vector<1x128xf32> to vector<32x128xf32>
    %5 = arith.addf %2, %4 : vector<32x128xf32>
    %c0_5 = arith.constant 0 : index
    %c0_6 = arith.constant 0 : index
    %6 = vector.load %arg3[%c0_5, %c0_6] : memref<128x128xf32, #tpu.memory_space<vmem>>, vector<128x128xf32>
    %cst_7 = arith.constant dense<0.000000e+00> : vector<32x128xf32>
    %7 = tpu.matmul %5, %6, %cst_7 {dimension_numbers = #tpu.dot_dimension_numbers<[1], [0], [0], [1], [0, 0, 1, 1], [], []>} : vector<32x128xf32>, vector<128x128xf32>, vector<32x128xf32> -> vector<32x128xf32>
    %c0_8 = arith.constant 0 : index
    %c0_9 = arith.constant 0 : index
    %8 = vector.load %arg5[%c0_8, %c0_9] : memref<1x128xf32, #tpu.memory_space<vmem>>, vector<1x128xf32>
    %9 = vector.broadcast %8 : vector<1x128xf32> to vector<32x128xf32>
    %10 = arith.addf %7, %9 : vector<32x128xf32>
    %c0_10 = arith.constant 0 : index
    %c0_11 = arith.constant 0 : index
    %11 = vector.load %arg6[%c0_10, %c0_11] : memref<32x128xf32, #tpu.memory_space<vmem>>, vector<32x128xf32>
    tpu.vector_store %arg6[%c0_10, %c0_11], %10 {strides = array<i32>} : memref<32x128xf32, #tpu.memory_space<vmem>>, vector<32x128xf32>,
    return
  }
  func.func @transform_0(%arg0: i32) -> (i32, i32) {
    %c0_i32 = arith.constant 0 : i32
    %c0_i32_0 = arith.constant 0 : i32
    return %arg0, %c0_i32 : i32, i32
  }
  func.func @transform_1(%arg0: i32) -> (i32, i32) {
    %c0_i32 = arith.constant 0 : i32
    %c0_i32_0 = arith.constant 0 : i32
    %c0_i32_1 = arith.constant 0 : i32
    return %c0_i32, %c0_i32_0 : i32, i32
  }
  func.func @transform_2(%arg0: i32) -> (i32, i32) {
    %c0_i32 = arith.constant 0 : i32
    %c0_i32_0 = arith.constant 0 : i32
    %c0_i32_1 = arith.constant 0 : i32
    return %c0_i32, %c0_i32_0 : i32, i32
  }
  func.func @transform_3(%arg0: i32) -> (i32, i32) {
    %c0_i32 = arith.constant 0 : i32
    %c0_i32_0 = arith.constant 0 : i32
    %c0_i32_1 = arith.constant 0 : i32
    return %c0_i32, %c0_i32_0 : i32, i32
  }
  func.func @transform_4(%arg0: i32) -> (i32, i32) {
    %c0_i32 = arith.constant 0 : i32
    %c0_i32_0 = arith.constant 0 : i32
    %c0_i32_1 = arith.constant 0 : i32
    return %c0_i32, %c0_i32_0 : i32, i32
  }
  func.func @transform_5(%arg0: i32) -> (i32, i32) {
    %c0_i32 = arith.constant 0 : i32
    %c0_i32_0 = arith.constant 0 : i32
    return %arg0, %c0_i32 : i32, i32
  }
}

</mosaic_0001>

<bundles_post_ra>
// kernel: tpu_custom_call.1
= control target key start
LH: loop header
LB: loop body
LE: loop exit
PB: predicated region body
PF: predicated region fallthrough
CT: control target
= control target key end

     0   :  { %10 = vsyncpa [#allocation3], 0  ;;  %s695_s0 = inlined_call_operand.hbm [shape: f32[32,128], index: 0, kind: input, shape index: {}]   ;;  %s696_s1 = inlined_call_operand.hbm [shape: f32[128,128], index: 1, kind: input, shape index: {}]   ;;  %s697_s2 = inlined_call_operand.hbm [shape: f32[128,128], index: 2, kind: input, shape index: {}]   ;;  %s698_s3 = inlined_call_operand.vmem [shape: f32[1,128], index: 3, kind: input, shape index: {}]   ;;  %s699_s4 = inlined_call_operand.vmem [shape: f32[1,128], index: 4, kind: input, shape index: {}]   ;;  %s700_s5 = inlined_call_operand.hbm [shape: f32[32,128], index: 5, kind: output, shape index: {}]  }
   0x1   :  { %11 = vsyncpa [#allocation6], 0 }
   0x2   :  { %12 = vsyncpa [#allocation4], 0  ;;  %s586_s18 = smov [#allocation5]   ;;  %s587_s20 = smov [#allocation2]  }
   0x3   :  { %s30_s19 = sshll.u32 %s586_s18, 4  ;;  %s18_s21 = sshll.u32 %s587_s20, 4  ;;  %s31_s19 = int_to_ptr.vmem [resolvable:$true] %s30_s19  ;;  %s622_s21 = int_to_ptr.vmem [resolvable:$true] %s18_s21 }
   0x4   :  { %s492_s24 = scalar_lea.hbm %s696_s1, 2048 }
   0x5   :  { %p493_p0 = scmp.ne.s32.totalorder %s696_s1, %s492_s24  ;;  %p496_p1 = scmp.lt.u32.totalorder %s492_s24, %s696_s1 }
   0x7   :  { %p498_p2 = pnand %p496_p1, %p493_p0 }
   0x9   :  { %501 = shalt.err (!%p498_p2)
}
   0xa   :  { %s502_s29 = scalar_lea.vmem %s31_s19, 2048  ;;  %p507_p4 = scmp.lt.s32.totalorder %s31_s19, %s31_s19 }
   0xb   :  { %p503_p3 = scmp.ne.s32.totalorder %s31_s19, %s502_s29  ;;  %p508_p5 = scmp.lt.s32.totalorder %s502_s29, %s502_s29 }
   0xd   :  { %p509_p6 = por %p508_p5, %p507_p4 }
   0xf   :  { %p510_p7 = pnand %p509_p6, %p503_p3 }
  0x11   :  { %513 = shalt.err (!%p510_p7)
}
  0x12   :  { %s588_s30 = smov 128   ;;  %s589_s6 = smov 8  }
  0x13   :  { %36 = dma.hbm_to_vmem [thread:$0]  %s696_s1, 2048, %s31_s19, [#allocation6], %s588_s30, %s588_s30, %s589_s6  }
  0x14   :  { %s514_s11 = scalar_lea.hbm %s695_s0, 512 }
  0x15   :  { %p515_p8 = scmp.ne.s32.totalorder %s695_s0, %s514_s11  ;;  %p518_p9 = scmp.lt.u32.totalorder %s514_s11, %s695_s0 }
  0x17   :  { %p520_p10 = pnand %p518_p9, %p515_p8 }
  0x19   :  { %523 = shalt.err (!%p520_p10)
}
  0x1a   :  { %s524_s16 = scalar_lea.vmem %s622_s21, 512  ;;  %p529_p12 = scmp.lt.s32.totalorder %s622_s21, %s622_s21 }
  0x1b   :  { %p525_p11 = scmp.ne.s32.totalorder %s622_s21, %s524_s16  ;;  %p530_p13 = scmp.lt.s32.totalorder %s524_s16, %s524_s16 }
  0x1d   :  { %p531_p0 = por %p530_p13, %p529_p12 }
  0x1f   :  { %p532_p1 = pnand %p531_p0, %p525_p11 }
  0x21   :  { %535 = shalt.err (!%p532_p1)
}
  0x22   :  { %24 = dma.hbm_to_vmem [thread:$0]  %s695_s0, 512, %s622_s21, [#allocation3], %s588_s30, %s588_s30, %s589_s6  }
  0x23   :  { %s590_s18 = smov [#allocation7]   ;;  %s536_s23 = scalar_lea.hbm %s697_s2, 2048 }
  0x24   :  { %s42_s19 = sshll.u32 %s590_s18, 4  ;;  %p537_p2 = scmp.ne.s32.totalorder %s697_s2, %s536_s23  ;;  %s43_s19 = int_to_ptr.vmem [resolvable:$true] %s42_s19 }
  0x25   :  { %p540_p3 = scmp.lt.u32.totalorder %s536_s23, %s697_s2 }
  0x27   :  { %p542_p4 = pnand %p540_p3, %p537_p2 }
  0x29   :  { %545 = shalt.err (!%p542_p4)
}
  0x2a   :  { %s546_s28 = scalar_lea.vmem %s43_s19, 2048  ;;  %p551_p6 = scmp.lt.s32.totalorder %s43_s19, %s43_s19 }
  0x2b   :  { %p547_p5 = scmp.ne.s32.totalorder %s43_s19, %s546_s28  ;;  %p552_p7 = scmp.lt.s32.totalorder %s546_s28, %s546_s28 }
  0x2d   :  { %p553_p8 = por %p552_p7, %p551_p6 }
  0x2f   :  { %p554_p9 = pnand %p553_p8, %p547_p5 }
  0x31   :  { %557 = shalt.err (!%p554_p9)
}
  0x32   :  { %48 = dma.hbm_to_vmem [thread:$0]  %s697_s2, 2048, %s43_s19, [#allocation6], %s588_s30, %s588_s30, %s589_s6  }
  0x33   :  { %580 = dma.done.wait [#allocation3], 512  }
  0x34   :  { %581 = vsyncadd [#allocation3], 4294966784 }
  0x35   :  { %582 = dma.done.wait [#allocation6], 4096  }
  0x36   :  { %583 = vsyncadd [#allocation6], 4294963200  ;;  %v66_v0 = vld [vmem:[#allocation5] sm:$0xff]  ;;  %v67_v1 = vld [vmem:[#allocation5 + $0x8] sm:$0xff] }
  0x37   :  { %v68_v2 = vld [vmem:[#allocation5 + $0x10] sm:$0xff]  ;;  %v422_v3 = vpack.c.bf16 %v67_v1, %v66_v0  ;;  %v69_v4 = vld [vmem:[#allocation5 + $0x18] sm:$0xff]  ;;  %v70_v6 = vld [vmem:[#allocation5 + $0x20] sm:$0xff] }
  0x38   :  { %v426_v5 = vpack.c.bf16 %v69_v4, %v68_v2  ;;  %v71_v7 = vld [vmem:[#allocation5 + $0x28] sm:$0xff]  ;;  %v62_v9 = vld [vmem:[#allocation2] sm:$0xff]  ;;  %v72_v10 = vld [vmem:[#allocation5 + $0x30] sm:$0xff] }
  0x39   :  { %423 = vmatprep.subr.bf16.mxu0 %v422_v3  ;;  %v430_v8 = vpack.c.bf16 %v71_v7, %v70_v6  ;;  %v73_v11 = vld [vmem:[#allocation5 + $0x38] sm:$0xff]  ;;  %378 = vmatprep.mubr.f32.mxu0 %v62_v9  ;;  %v174_v12 = vld [vmem:[#allocation7] sm:$0xff]  ;;  %v175_v13 = vld [vmem:[#allocation7 + $0x8] sm:$0xff] }
  0x3a   :  { %425 = vmatpush3.bf16.msra.mxu0 %v422_v3  ;;  %v176_v14 = vld [vmem:[#allocation7 + $0x10] sm:$0xff]  ;;  %v177_v15 = vld [vmem:[#allocation7 + $0x18] sm:$0xff]  ;;  %v454_v16 = vpack.c.bf16 %v175_v13, %v174_v12  ;;  %v434_v18 = vpack.c.bf16 %v73_v11, %v72_v10  ;;  %v178_v19 = vld [vmem:[#allocation7 + $0x20] sm:$0xff] }
  0x3b   :  { %427 = vmatprep.subr.bf16.mxu0 %v426_v5  ;;  %v458_v17 = vpack.c.bf16 %v177_v15, %v176_v14  ;;  %v179_v20 = vld [vmem:[#allocation7 + $0x28] sm:$0xff]  ;;  %v74_v21 = vld [vmem:[#allocation5 + $0x40] sm:$0xff]  ;;  %v180_v25 = vld [vmem:[#allocation7 + $0x30] sm:$0xff] }
  0x3c   :  { %v75_v22 = vld [vmem:[#allocation5 + $0x48] sm:$0xff]  ;;  %455 = vmatprep.subr.bf16.mxu1 %v454_v16  ;;  %v462_v23 = vpack.c.bf16 %v179_v20, %v178_v19  ;;  %v181_v26 = vld [vmem:[#allocation7 + $0x38] sm:$0xff]  ;;  %v76_v27 = vld [vmem:[#allocation5 + $0x50] sm:$0xff] }
  0x3d   :  { %457 = vmatpush3.bf16.msra.mxu1 %v454_v16  ;;  %v438_v24 = vpack.c.bf16 %v75_v22, %v74_v21  ;;  %v77_v28 = vld [vmem:[#allocation5 + $0x58] sm:$0xff]  ;;  %v466_v29 = vpack.c.bf16 %v181_v26, %v180_v25  ;;  %v182_v31 = vld [vmem:[#allocation7 + $0x40] sm:$0xff]  ;;  %v183_v32 = vld [vmem:[#allocation7 + $0x48] sm:$0xff] }
  0x3e   :  { %429 = vmatpush3.bf16.msra.mxu0 %v426_v5  ;;  %459 = vmatprep.subr.bf16.mxu1 %v458_v17  ;;  %v442_v30 = vpack.c.bf16 %v77_v28, %v76_v27  ;;  %v78_v33 = vld [vmem:[#allocation5 + $0x60] sm:$0xff]  ;;  %v79_v34 = vld [vmem:[#allocation5 + $0x68] sm:$0xff]  ;;  %v470_v35 = vpack.c.bf16 %v183_v32, %v182_v31  ;;  %v184_v37 = vld [vmem:[#allocation7 + $0x50] sm:$0xff] }
  0x3f   :  { %431 = vmatprep.subr.bf16.mxu0 %v430_v8  ;;  %v446_v36 = vpack.c.bf16 %v79_v34, %v78_v33  ;;  %v185_v38 = vld [vmem:[#allocation7 + $0x58] sm:$0xff]  ;;  %v80_v39 = vld [vmem:[#allocation5 + $0x70] sm:$0xff]  ;;  %v186_v43 = vld [vmem:[#allocation7 + $0x60] sm:$0xff] }
  0x40   :  { %v81_v40 = vld [vmem:[#allocation5 + $0x78] sm:$0xff]  ;;  %v474_v41 = vpack.c.bf16 %v185_v38, %v184_v37  ;;  %v187_v44 = vld [vmem:[#allocation7 + $0x68] sm:$0xff]  ;;  %v64_v47 = vld [vmem:[#allocation2 + $0x10] sm:$0xff] }
  0x41   :  { %461 = vmatpush3.bf16.msra.mxu1 %v458_v17  ;;  %v450_v42 = vpack.c.bf16 %v81_v40, %v80_v39  ;;  %v478_v45 = vpack.c.bf16 %v187_v44, %v186_v43  ;;  %v63_v46 = vld [vmem:[#allocation2 + $0x8] sm:$0xff]  ;;  %v65_v48 = vld [vmem:[#allocation2 + $0x18] sm:$0xff]  ;;  %v188_v49 = vld [vmem:[#allocation7 + $0x70] sm:$0xff] }
  0x42   :  { %433 = vmatpush3.bf16.msra.mxu0 %v430_v8  ;;  %463 = vmatprep.subr.bf16.mxu1 %v462_v23  ;;  %v189_v50 = vld [vmem:[#allocation7 + $0x78] sm:$0xff]  ;;  %v304_v52 = vld [vmem:[%s698_s3] ss:$0 sm:$0xff]  ;;  %s591_s3 = smov [#allocation8]  }
  0x43   :  { %435 = vmatprep.subr.bf16.mxu0 %v434_v18  ;;  %v482_v51 = vpack.c.bf16 %v189_v50, %v188_v49  ;;  %v305_v61 = vld [vmem:[%s699_s4] ss:$0 sm:$0xff]  ;;  %s291_s9 = sshll.u32 %s591_s3, 4  ;;  %s292_s9 = int_to_ptr.vmem [resolvable:$true] %s291_s9 }
  0x44   :  { %s558_s10 = scalar_lea.vmem %s292_s9, 512  ;;  %p563_p11 = scmp.lt.s32.totalorder %s292_s9, %s292_s9 }
  0x45   :  { %465 = vmatpush3.bf16.msra.mxu1 %v462_v23  ;;  %p559_p10 = scmp.ne.s32.totalorder %s292_s9, %s558_s10  ;;  %p564_p12 = scmp.lt.s32.totalorder %s558_s10, %s558_s10 }
  0x46   :  { %437 = vmatpush3.bf16.msra.mxu0 %v434_v18  ;;  %467 = vmatprep.subr.bf16.mxu1 %v466_v29 }
  0x47   :  { %439 = vmatprep.subr.bf16.mxu0 %v438_v24  ;;  %p565_p13 = por %p564_p12, %p563_p11 }
  0x49   :  { %469 = vmatpush3.bf16.msra.mxu1 %v466_v29  ;;  %p566_p0 = pnand %p565_p13, %p559_p10 }
  0x4a   :  { %441 = vmatpush3.bf16.msra.mxu0 %v438_v24  ;;  %471 = vmatprep.subr.bf16.mxu1 %v470_v35 }
  0x4b   :  { %443 = vmatprep.subr.bf16.mxu0 %v442_v30 }
  0x4d   :  { %473 = vmatpush3.bf16.msra.mxu1 %v470_v35 }
  0x4e   :  { %445 = vmatpush3.bf16.msra.mxu0 %v442_v30  ;;  %475 = vmatprep.subr.bf16.mxu1 %v474_v41 }
  0x4f   :  { %447 = vmatprep.subr.bf16.mxu0 %v446_v36 }
  0x51   :  { %477 = vmatpush3.bf16.msra.mxu1 %v474_v41 }
  0x52   :  { %449 = vmatpush3.bf16.msra.mxu0 %v446_v36  ;;  %479 = vmatprep.subr.bf16.mxu1 %v478_v45 }
  0x53   :  { %451 = vmatprep.subr.bf16.mxu0 %v450_v42 }
  0x55   :  { %481 = vmatpush3.bf16.msra.mxu1 %v478_v45 }
  0x56   :  { %453 = vmatpush3.bf16.msra.mxu0 %v450_v42  ;;  %483 = vmatprep.subr.bf16.mxu1 %v482_v51 }
  0x59   :  { %379 = vmatmul.mubr.f32.vlgmr.msra.gmra.mrb[0].mxu0 %v63_v46  ;;  %485 = vmatpush3.bf16.msra.mxu1 %v482_v51 }
  0x5a   :  { %381 = vmatprep.mubr.f32.mxu0 %v64_v47 }
  0x5d   :  { %382 = vmatmul.mubr.f32.gmra.mrb[2].mxu0 %v65_v48 }
 0x12c   :  { %v380_v53 = vpop.f32.mrb[0].mxu0 }
 0x12d   :  { %v155_v54 = vpop.f32.mrb[1].mxu0  ;;  %v161_v56 = vadd.f32 %v380_v53, %v304_v52 }
 0x12e   :  { %v156_v55 = vadd.f32 %v304_v52, %v155_v54 }
 0x130   :  { %v383_v57 = vpop.f32.mrb[2].mxu0  ;;  %416 = vmatprep.mubr.f32.mxu1 %v156_v55 }
 0x131   :  { %v165_v58 = vpop.f32.mrb[3].mxu0  ;;  %417 = vmatmul.mubr.f32.vlgmr.msra.gmra.mrb[0].mxu1 %v161_v56  ;;  %v171_v60 = vadd.f32 %v383_v57, %v304_v52 }
 0x132   :  { %v166_v59 = vadd.f32 %v304_v52, %v165_v58 }
 0x134   :  { %419 = vmatprep.mubr.f32.mxu1 %v166_v59 }
 0x135   :  { %420 = vmatmul.mubr.f32.gmra.mrb[2].mxu1 %v171_v60 }
 0x204   :  { %v418_v62 = vpop.f32.mrb[0].mxu1 }
 0x205   :  { %v269_v63 = vadd.f32 %v418_v62, %v305_v61  ;;  %v263_v0 = vpop.f32.mrb[1].mxu1 }
 0x206   :  { %v264_v1 = vadd.f32 %v305_v61, %v263_v0 }
 0x207   :  { %283 = vst [vmem:[#allocation8 + $0x8] sm:$0xff] %v269_v63 }
 0x208   :  { %282 = vst [vmem:[#allocation8] sm:$0xff] %v264_v1  ;;  %v421_v2 = vpop.f32.mrb[2].mxu1 }
 0x209   :  { %v279_v3 = vadd.f32 %v421_v2, %v305_v61  ;;  %v273_v4 = vpop.f32.mrb[3].mxu1 }
 0x20a   :  { %v274_v5 = vadd.f32 %v305_v61, %v273_v4 }
 0x20b   :  { %285 = vst [vmem:[#allocation8 + $0x18] sm:$0xff] %v279_v3 }
 0x20c   :  { %284 = vst [vmem:[#allocation8 + $0x10] sm:$0xff] %v274_v5 }
 0x20d   :  { %569 = shalt.err (!%p566_p0)
}
 0x20e   :  { %s570_s12 = scalar_lea.hbm %s700_s5, 512 }
 0x20f   :  { %p571_p1 = scmp.ne.s32.totalorder %s700_s5, %s570_s12  ;;  %p574_p2 = scmp.lt.u32.totalorder %s570_s12, %s700_s5 }
 0x211   :  { %p576_p3 = pnand %p574_p2, %p571_p1 }
 0x213   :  { %579 = shalt.err (!%p576_p3)
}
 0x214   :  { %297 = dma.vmem_to_hbm [thread:$0]  %s292_s9, 512, %s700_s5, [#allocation4], %s588_s30, %s588_s30, %s589_s6  }
 0x215   :  { %584 = dma.done.wait [#allocation4], 512  }
 0x216   :  { %585 = vsyncadd [#allocation4], 4294966784 }
 0x217   :  { %301 = vsyncpa [#allocation3], 1 }
 0x218   :  { %302 = vsyncpa [#allocation6], 1 }
 0x219   :  { %303 = vsyncpa [#allocation4], 1 }

</bundles_post_ra>
